<compile_context>
chip_gen: v5e
topology: v5e:2x2
jax: 0.10.0
libtpu: 0.0.40
codegen_flags: <defaults>
</compile_context>

<pallas_src>
import functools

import numpy as np
import jax
import jax.numpy as jnp
from jax import lax
from jax.experimental import pallas as pl
from jax.experimental.pallas import tpu as pltpu


# --------------------------------------------------------------------------
# host-side helpers (parameter / coefficient setup = glue, done once at init)
# --------------------------------------------------------------------------
def find_nearest_square(h, w):
    area = h * w
    side = round(area ** 0.5)
    power = round(float(np.log2(side)))
    side = 2 ** power
    return (side, side)


def _cubic1(x, A=-0.75):
    return ((A + 2.0) * x - (A + 3.0)) * x * x + 1.0


def _cubic2(x, A=-0.75):
    return ((A * x - 5.0 * A) * x + 8.0 * A) * x - 4.0 * A


def bicubic_matrix(out_size, in_size):
    """Interpolation matrix matching torch F.interpolate(mode='bicubic',
    align_corners=False, antialias=False): out = M @ in along one axis."""
    scale = in_size / out_size
    M = np.zeros((out_size, in_size), dtype=np.float32)
    for i in range(out_size):
        src = scale * (i + 0.5) - 0.5
        i0 = int(np.floor(src))
        t = src - i0
        w = (_cubic2(t + 1.0), _cubic1(t), _cubic1(1.0 - t), _cubic2(2.0 - t))
        for k in range(4):
            idx = min(max(i0 - 1 + k, 0), in_size - 1)
            M[i, idx] += w[k]
    return M


def _tap_masks(S):
    """Boundary masks for the 9 conv taps in the flattened (i*S + j) layout.

    mask[k, 0, i*S + j] == 1 iff (i + oy, j + ox) is inside the un-padded
    image, with k = (oy+1)*3 + (ox+1).  Zero everywhere the rolled activation
    would be wrapped / out-of-bounds (emulates zero padding)."""
    ii, jj = np.meshgrid(np.arange(S), np.arange(S), indexing="ij")
    masks = np.zeros((9, 1, S * S), dtype=np.float32)
    for k in range(9):
        oy, ox = k // 3 - 1, k % 3 - 1
        valid = ((ii + oy >= 0) & (ii + oy < S) &
                 (jj + ox >= 0) & (jj + ox < S))
        masks[k, 0] = valid.reshape(-1).astype(np.float32)
    return masks


def init_landscape_to_square(landscape_size, conv_weight):
    """Build all constant operands once (review item 8: hoisted out of the
    per-call wrapper).  conv_weight: effective (weight-normed) (C_out, C_in, 3, 3)."""
    H, W = landscape_size
    conv_weight = np.asarray(conv_weight, dtype=np.float32)
    C_out, C_in = conv_weight.shape[:2]
    S, _ = find_nearest_square(H, W)
    SS = S * S
    assert SS % 128 == 0, "lane-dense layout assumes S*S to be a multiple of 128"

    wh = bicubic_matrix(S, H)                       # (S, H)
    ww = bicubic_matrix(S, W)                       # (S, W)
    # Per-channel broadcast so the in-kernel resize is a clean batched matmul
    # (both einsum operands carry the batch dim).  A few KiB resident here.
    # TODO(synk): for large C_in broadcast in-kernel instead of replicating.
    wwt = jnp.asarray(np.broadcast_to(ww.T[None], (C_in, W, S)).copy(),
                      dtype=jnp.bfloat16)           # (C_in, W, S)
    whh = jnp.asarray(np.broadcast_to(wh[None], (C_in, S, H)).copy(),
                      dtype=jnp.bfloat16)           # (C_in, S, H)
    # Conv weights with taps folded into K: w2[o, (ky*3+kx)*C_in + c] = w[o,c,ky,kx]
    w2 = jnp.asarray(np.transpose(conv_weight, (0, 2, 3, 1))
                     .reshape(C_out, 9 * C_in), dtype=jnp.bfloat16)
    masks = jnp.asarray(_tap_masks(S))              # (9, 1, SS) f32, binary
    return dict(S=S, H=H, W=W, C_in=C_in, C_out=C_out,
                wwt=wwt, whh=whh, w2=w2, masks=masks)


# --------------------------------------------------------------------------
# Pallas kernel: separable bicubic resize (2 matmuls) + fused 3x3 conv (1 matmul)
# --------------------------------------------------------------------------
def _l2s_kernel(x_ref, wwt_ref, whh_ref, w2_ref, mask_ref, o_ref,
                flat_ref, stk_ref, *, S, C_in):
    # x_ref:    (1, C_in, H, W)   VMEM bf16  one image (grid axis = batch)
    # wwt_ref:  (C_in, W, S)      VMEM bf16  W-direction bicubic weights
    # whh_ref:  (C_in, S, H)      VMEM bf16  H-direction bicubic weights
    # w2_ref:   (C_out, 9*C_in)   VMEM bf16  conv weights, taps folded into K
    # mask_ref: (9, 1, SS)        VMEM f32   zero-padding boundary masks
    # o_ref:    (1, C_out, SS)    VMEM f32   lane-dense output (SS % 128 == 0)
    # flat_ref: (C_in, SS)        VMEM f32   scratch: flattened resized image
    # stk_ref:  (9*C_in, SS)      VMEM f32   scratch: stacked conv taps
    SS = S * S
    x3 = x_ref[0]                                               # (C_in, H, W)

    # ---- separable bicubic resize: 2 batched MXU matmuls, bf16 in / f32 acc ----
    r1 = jnp.einsum('chw,cwj->chj', x3, wwt_ref[...],
                    preferred_element_type=jnp.float32)         # (C_in, H, S)
    r2 = jnp.einsum('cih,chj->cij', whh_ref[...],
                    r1.astype(jnp.bfloat16),
                    preferred_element_type=jnp.float32)         # (C_in, S, S)

    # ---- flatten to the lane-dense (C_in, S*S) conv layout ----
    # (S static row stores; avoids an in-kernel minor-dim reshape)
    for i in range(S):
        flat_ref[:, i * S:(i + 1) * S] = r2[:, i, :]
    flat = flat_ref[...]                                        # (C_in, SS) f32

    # ---- stack the 9 shifted & zero-pad-masked taps -> (9*C_in, SS) ----
    # shifts run on the XLU (pltpu.roll) and the 0/1 mask multiply on the VPU,
    # both off the MXU critical path.
    for k in range(9):
        oy, ox = k // 3 - 1, k % 3 - 1
        if oy == 0 and ox == 0:
            shifted = flat                     # centre tap: no shift, no mask
        else:
            shift = (SS - (oy * S + ox)) % SS  # static
            shifted = pltpu.roll(flat, shift, axis=1) * mask_ref[k]
        stk_ref[k * C_in:(k + 1) * C_in, :] = shifted

    # ---- 3x3 conv (stride 1, pad 1, no bias) as ONE MXU matmul, K = 9*C_in ----
    out = jnp.dot(w2_ref[...], stk_ref[...].astype(jnp.bfloat16),
                  preferred_element_type=jnp.float32)           # (C_out, SS)
    o_ref[0] = out.astype(o_ref.dtype)


def landscape_to_square(x, params):
    """x: (N, C_in, H, W) float32 NCHW.  params: from init_landscape_to_square.
    Returns (N, C_out, S, S) float32."""
    N, C_in, H, W = x.shape
    S, C_out = params['S'], params['C_out']
    SS = S * S
    x_bf = x.astype(jnp.bfloat16)

    kernel = functools.partial(_l2s_kernel, S=S, C_in=C_in)
    out_flat = pl.pallas_call(
        kernel,
        out_shape=jax.ShapeDtypeStruct((N, C_out, SS), jnp.float32),
        grid_spec=pltpu.PrefetchScalarGridSpec(
            num_scalar_prefetch=0,
            grid=(N,),
            in_specs=[
                pl.BlockSpec((1, C_in, H, W), lambda n: (n, 0, 0, 0)),
                pl.BlockSpec((C_in, W, S), lambda n: (0, 0, 0)),
                pl.BlockSpec((C_in, S, H), lambda n: (0, 0, 0)),
                pl.BlockSpec((C_out, 9 * C_in), lambda n: (0, 0)),
                pl.BlockSpec((9, 1, SS), lambda n: (0, 0, 0)),
            ],
            out_specs=pl.BlockSpec((1, C_out, SS), lambda n: (n, 0, 0)),
            scratch_shapes=[
                pltpu.VMEM((C_in, SS), jnp.float32),       # flattened resize
                pltpu.VMEM((9 * C_in, SS), jnp.float32),   # stacked conv taps
            ],
        ),
        compiler_params=pltpu.CompilerParams(
            dimension_semantics=("parallel",),
            vmem_limit_bytes=32 * 1024 * 1024),
        cost_estimate=pl.CostEstimate(
            flops=2 * N * (C_in * H * W * S            # W-direction resize
                           + C_in * S * H * S          # H-direction resize
                           + C_out * 9 * C_in * SS),   # fused 3x3 conv
            transcendentals=0,
            bytes_accessed=2 * N * C_in * H * W + 4 * N * C_out * SS
                           + 2 * (C_in * W * S + C_in * S * H
                                  + C_out * 9 * C_in) + 4 * 9 * SS),
    )(x_bf, params['wwt'], params['whh'], params['w2'], params['masks'])

    return out_flat.reshape(N, C_out, S, S)


# --------------------------------------------------------------------------
if __name__ == "__main__":
    key = jax.random.PRNGKey(0)
    k1, k2 = jax.random.split(key)

    # small landscape input: H=8, W=32  ->  find_nearest_square = (16, 16)
    N, C_in, H, W = 2, 4, 8, 32
    C_out = 8
    S, _ = find_nearest_square(H, W)
    assert S == 16

    x = jax.random.normal(k1, (N, C_in, H, W), dtype=jnp.float32)

    # weight_norm(Conv2d(...)) parameters, deterministic init.
    # weight_norm(dim=0): w = g * v / ||v|| over dims (1,2,3); g init = ||v||.
    v = 0.1 * jax.random.normal(k2, (C_out, C_in, 3, 3), dtype=jnp.float32)
    v_norm = jnp.sqrt(jnp.sum(v * v, axis=(1, 2, 3), keepdims=True))
    g = v_norm
    conv_weight = g * v / v_norm

    params = init_landscape_to_square((H, W), conv_weight)   # built once
    out = landscape_to_square(x, params)
    out = jax.block_until_ready(out)

    # pure-JAX reference mirroring the kernel's bf16-operand / f32-accumulate
    # precision (same bicubic matrices, but an independent lax.conv path).
    wh = jnp.asarray(bicubic_matrix(S, H))   # (S, H)
    ww = jnp.asarray(bicubic_matrix(S, W))   # (S, W)
    bf = lambda a: a.astype(jnp.bfloat16).astype(jnp.float32)
    r1 = jnp.einsum('nchw,jw->nchj', bf(x), bf(ww))
    r2 = jnp.einsum('ih,nchj->ncij', bf(wh), bf(r1))
    ref = lax.conv_general_dilated(
        bf(r2), bf(conv_weight), window_strides=(1, 1),
        padding=((1, 1), (1, 1)),
        dimension_numbers=('NCHW', 'OIHW', 'NCHW'))

    assert out.shape == (N, C_out, S, S)
    assert np.allclose(np.asarray(out), np.asarray(ref), atol=3e-2, rtol=3e-2)

    print("KERNEL_OK")
</pallas_src>

<mosaic_0001>
module attributes {stable_mosaic.version = 11 : i64} {
  func.func @_l2s_kernel(%arg0: i32, %arg1: memref<1x4x8x32xbf16, #tpu.memory_space<vmem>>, %arg2: memref<4x32x16xbf16, #tpu.memory_space<vmem>>, %arg3: memref<4x16x8xbf16, #tpu.memory_space<vmem>>, %arg4: memref<8x36xbf16, #tpu.memory_space<vmem>>, %arg5: memref<9x1x256xf32, #tpu.memory_space<vmem>>, %arg6: memref<1x8x256xf32, #tpu.memory_space<vmem>>, %arg7: memref<4x256xf32, #tpu.memory_space<vmem>>, %arg8: memref<36x256xf32, #tpu.memory_space<vmem>>) attributes {dimension_semantics = [#tpu.dimension_semantics<parallel>], iteration_bounds = array<i64: 2>, scalar_prefetch = 0 : i64, scratch_operands = 2 : i64, tpu.core_type = #tpu.core_type<tc>, window_params = [{transform_indices = @transform_0, window_bounds = array<i64: 1, 4, 8, 32>}, {pipeline_mode = #tpu.pipeline_mode<synchronous>, transform_indices = @transform_1, window_bounds = array<i64: 4, 32, 16>}, {pipeline_mode = #tpu.pipeline_mode<synchronous>, transform_indices = @transform_2, window_bounds = array<i64: 4, 16, 8>}, {pipeline_mode = #tpu.pipeline_mode<synchronous>, transform_indices = @transform_3, window_bounds = array<i64: 8, 36>}, {pipeline_mode = #tpu.pipeline_mode<synchronous>, transform_indices = @transform_4, window_bounds = array<i64: 9, 1, 256>}, {transform_indices = @transform_5, window_bounds = array<i64: 1, 8, 256>}]} {
    %c0 = arith.constant 0 : index
    %c0_0 = arith.constant 0 : index
    %c0_1 = arith.constant 0 : index
    %c0_2 = arith.constant 0 : index
    %0 = vector.load %arg1[%c0, %c0_0, %c0_1, %c0_2] : memref<1x4x8x32xbf16, #tpu.memory_space<vmem>>, vector<1x4x8x32xbf16>
    %1 = vector.shape_cast %0 : vector<1x4x8x32xbf16> to vector<4x8x32xbf16>
    %c0_3 = arith.constant 0 : index
    %c0_4 = arith.constant 0 : index
    %c0_5 = arith.constant 0 : index
    %2 = vector.load %arg2[%c0_3, %c0_4, %c0_5] : memref<4x32x16xbf16, #tpu.memory_space<vmem>>, vector<4x32x16xbf16>
    "tpu.trace_start"() <{level = 10 : i32, message = "chw,cwj->chj"}> : () -> ()
    %cst = arith.constant dense<0.000000e+00> : vector<4x8x16xf32>
    %3 = tpu.matmul %1, %2, %cst {dimension_numbers = #tpu.dot_dimension_numbers<[2], [1], [1], [2], [0, 0, 0, 1, 1, 2], [0], [0]>} : vector<4x8x32xbf16>, vector<4x32x16xbf16>, vector<4x8x16xf32> -> vector<4x8x16xf32>
    "tpu.trace_stop"() : () -> ()
    %c0_6 = arith.constant 0 : index
    %c0_7 = arith.constant 0 : index
    %c0_8 = arith.constant 0 : index
    %4 = vector.load %arg3[%c0_6, %c0_7, %c0_8] : memref<4x16x8xbf16, #tpu.memory_space<vmem>>, vector<4x16x8xbf16>
    %5 = arith.truncf %3 : vector<4x8x16xf32> to vector<4x8x16xbf16>
    "tpu.trace_start"() <{level = 10 : i32, message = "cih,chj->cij"}> : () -> ()
    %cst_9 = arith.constant dense<0.000000e+00> : vector<4x16x16xf32>
    %6 = tpu.matmul %4, %5, %cst_9 {dimension_numbers = #tpu.dot_dimension_numbers<[2], [1], [1], [2], [0, 0, 0, 1, 1, 2], [0], [0]>} : vector<4x16x8xbf16>, vector<4x8x16xbf16>, vector<4x16x16xf32> -> vector<4x16x16xf32>
    "tpu.trace_stop"() : () -> ()
    %7 = vector.extract_strided_slice %6 {offsets = [0, 0, 0], sizes = [4, 1, 16], strides = [1, 1, 1]} : vector<4x16x16xf32> to vector<4x1x16xf32>
    %8 = vector.shape_cast %7 : vector<4x1x16xf32> to vector<4x16xf32>
    %c0_10 = arith.constant 0 : index
    %c0_11 = arith.constant 0 : index
    %9 = vector.load %arg7[%c0_10, %c0_11] : memref<4x256xf32, #tpu.memory_space<vmem>>, vector<4x16xf32>
    tpu.vector_store %arg7[%c0_10, %c0_11], %8 {strides = array<i32>} : memref<4x256xf32, #tpu.memory_space<vmem>>, vector<4x16xf32>,
    %10 = vector.extract_strided_slice %6 {offsets = [0, 1, 0], sizes = [4, 1, 16], strides = [1, 1, 1]} : vector<4x16x16xf32> to vector<4x1x16xf32>
    %11 = vector.shape_cast %10 : vector<4x1x16xf32> to vector<4x16xf32>
    %c0_12 = arith.constant 0 : index
    %c16 = arith.constant 16 : index
    %12 = vector.load %arg7[%c0_12, %c16] : memref<4x256xf32, #tpu.memory_space<vmem>>, vector<4x16xf32>
    tpu.vector_store %arg7[%c0_12, %c16], %11 {strides = array<i32>} : memref<4x256xf32, #tpu.memory_space<vmem>>, vector<4x16xf32>,
    %13 = vector.extract_strided_slice %6 {offsets = [0, 2, 0], sizes = [4, 1, 16], strides = [1, 1, 1]} : vector<4x16x16xf32> to vector<4x1x16xf32>
    %14 = vector.shape_cast %13 : vector<4x1x16xf32> to vector<4x16xf32>
    %c0_13 = arith.constant 0 : index
    %c32 = arith.constant 32 : index
    %15 = vector.load %arg7[%c0_13, %c32] : memref<4x256xf32, #tpu.memory_space<vmem>>, vector<4x16xf32>
    tpu.vector_store %arg7[%c0_13, %c32], %14 {strides = array<i32>} : memref<4x256xf32, #tpu.memory_space<vmem>>, vector<4x16xf32>,
    %16 = vector.extract_strided_slice %6 {offsets = [0, 3, 0], sizes = [4, 1, 16], strides = [1, 1, 1]} : vector<4x16x16xf32> to vector<4x1x16xf32>
    %17 = vector.shape_cast %16 : vector<4x1x16xf32> to vector<4x16xf32>
    %c0_14 = arith.constant 0 : index
    %c48 = arith.constant 48 : index
    %18 = vector.load %arg7[%c0_14, %c48] : memref<4x256xf32, #tpu.memory_space<vmem>>, vector<4x16xf32>
    tpu.vector_store %arg7[%c0_14, %c48], %17 {strides = array<i32>} : memref<4x256xf32, #tpu.memory_space<vmem>>, vector<4x16xf32>,
    %19 = vector.extract_strided_slice %6 {offsets = [0, 4, 0], sizes = [4, 1, 16], strides = [1, 1, 1]} : vector<4x16x16xf32> to vector<4x1x16xf32>
    %20 = vector.shape_cast %19 : vector<4x1x16xf32> to vector<4x16xf32>
    %c0_15 = arith.constant 0 : index
    %c64 = arith.constant 64 : index
    %21 = vector.load %arg7[%c0_15, %c64] : memref<4x256xf32, #tpu.memory_space<vmem>>, vector<4x16xf32>
    tpu.vector_store %arg7[%c0_15, %c64], %20 {strides = array<i32>} : memref<4x256xf32, #tpu.memory_space<vmem>>, vector<4x16xf32>,
    %22 = vector.extract_strided_slice %6 {offsets = [0, 5, 0], sizes = [4, 1, 16], strides = [1, 1, 1]} : vector<4x16x16xf32> to vector<4x1x16xf32>
    %23 = vector.shape_cast %22 : vector<4x1x16xf32> to vector<4x16xf32>
    %c0_16 = arith.constant 0 : index
    %c80 = arith.constant 80 : index
    %24 = vector.load %arg7[%c0_16, %c80] : memref<4x256xf32, #tpu.memory_space<vmem>>, vector<4x16xf32>
    tpu.vector_store %arg7[%c0_16, %c80], %23 {strides = array<i32>} : memref<4x256xf32, #tpu.memory_space<vmem>>, vector<4x16xf32>,
    %25 = vector.extract_strided_slice %6 {offsets = [0, 6, 0], sizes = [4, 1, 16], strides = [1, 1, 1]} : vector<4x16x16xf32> to vector<4x1x16xf32>
    %26 = vector.shape_cast %25 : vector<4x1x16xf32> to vector<4x16xf32>
    %c0_17 = arith.constant 0 : index
    %c96 = arith.constant 96 : index
    %27 = vector.load %arg7[%c0_17, %c96] : memref<4x256xf32, #tpu.memory_space<vmem>>, vector<4x16xf32>
    tpu.vector_store %arg7[%c0_17, %c96], %26 {strides = array<i32>} : memref<4x256xf32, #tpu.memory_space<vmem>>, vector<4x16xf32>,
    %28 = vector.extract_strided_slice %6 {offsets = [0, 7, 0], sizes = [4, 1, 16], strides = [1, 1, 1]} : vector<4x16x16xf32> to vector<4x1x16xf32>
    %29 = vector.shape_cast %28 : vector<4x1x16xf32> to vector<4x16xf32>
    %c0_18 = arith.constant 0 : index
    %c112 = arith.constant 112 : index
    %30 = vector.load %arg7[%c0_18, %c112] : memref<4x256xf32, #tpu.memory_space<vmem>>, vector<4x16xf32>
    tpu.vector_store %arg7[%c0_18, %c112], %29 {strides = array<i32>} : memref<4x256xf32, #tpu.memory_space<vmem>>, vector<4x16xf32>,
    %31 = vector.extract_strided_slice %6 {offsets = [0, 8, 0], sizes = [4, 1, 16], strides = [1, 1, 1]} : vector<4x16x16xf32> to vector<4x1x16xf32>
    %32 = vector.shape_cast %31 : vector<4x1x16xf32> to vector<4x16xf32>
    %c0_19 = arith.constant 0 : index
    %c128 = arith.constant 128 : index
    %33 = vector.load %arg7[%c0_19, %c128] : memref<4x256xf32, #tpu.memory_space<vmem>>, vector<4x16xf32>
    tpu.vector_store %arg7[%c0_19, %c128], %32 {strides = array<i32>} : memref<4x256xf32, #tpu.memory_space<vmem>>, vector<4x16xf32>,
    %34 = vector.extract_strided_slice %6 {offsets = [0, 9, 0], sizes = [4, 1, 16], strides = [1, 1, 1]} : vector<4x16x16xf32> to vector<4x1x16xf32>
    %35 = vector.shape_cast %34 : vector<4x1x16xf32> to vector<4x16xf32>
    %c0_20 = arith.constant 0 : index
    %c144 = arith.constant 144 : index
    %36 = vector.load %arg7[%c0_20, %c144] : memref<4x256xf32, #tpu.memory_space<vmem>>, vector<4x16xf32>
    tpu.vector_store %arg7[%c0_20, %c144], %35 {strides = array<i32>} : memref<4x256xf32, #tpu.memory_space<vmem>>, vector<4x16xf32>,
    %37 = vector.extract_strided_slice %6 {offsets = [0, 10, 0], sizes = [4, 1, 16], strides = [1, 1, 1]} : vector<4x16x16xf32> to vector<4x1x16xf32>
    %38 = vector.shape_cast %37 : vector<4x1x16xf32> to vector<4x16xf32>
    %c0_21 = arith.constant 0 : index
    %c160 = arith.constant 160 : index
    %39 = vector.load %arg7[%c0_21, %c160] : memref<4x256xf32, #tpu.memory_space<vmem>>, vector<4x16xf32>
    tpu.vector_store %arg7[%c0_21, %c160], %38 {strides = array<i32>} : memref<4x256xf32, #tpu.memory_space<vmem>>, vector<4x16xf32>,
    %40 = vector.extract_strided_slice %6 {offsets = [0, 11, 0], sizes = [4, 1, 16], strides = [1, 1, 1]} : vector<4x16x16xf32> to vector<4x1x16xf32>
    %41 = vector.shape_cast %40 : vector<4x1x16xf32> to vector<4x16xf32>
    %c0_22 = arith.constant 0 : index
    %c176 = arith.constant 176 : index
    %42 = vector.load %arg7[%c0_22, %c176] : memref<4x256xf32, #tpu.memory_space<vmem>>, vector<4x16xf32>
    tpu.vector_store %arg7[%c0_22, %c176], %41 {strides = array<i32>} : memref<4x256xf32, #tpu.memory_space<vmem>>, vector<4x16xf32>,
    %43 = vector.extract_strided_slice %6 {offsets = [0, 12, 0], sizes = [4, 1, 16], strides = [1, 1, 1]} : vector<4x16x16xf32> to vector<4x1x16xf32>
    %44 = vector.shape_cast %43 : vector<4x1x16xf32> to vector<4x16xf32>
    %c0_23 = arith.constant 0 : index
    %c192 = arith.constant 192 : index
    %45 = vector.load %arg7[%c0_23, %c192] : memref<4x256xf32, #tpu.memory_space<vmem>>, vector<4x16xf32>
    tpu.vector_store %arg7[%c0_23, %c192], %44 {strides = array<i32>} : memref<4x256xf32, #tpu.memory_space<vmem>>, vector<4x16xf32>,
    %46 = vector.extract_strided_slice %6 {offsets = [0, 13, 0], sizes = [4, 1, 16], strides = [1, 1, 1]} : vector<4x16x16xf32> to vector<4x1x16xf32>
    %47 = vector.shape_cast %46 : vector<4x1x16xf32> to vector<4x16xf32>
    %c0_24 = arith.constant 0 : index
    %c208 = arith.constant 208 : index
    %48 = vector.load %arg7[%c0_24, %c208] : memref<4x256xf32, #tpu.memory_space<vmem>>, vector<4x16xf32>
    tpu.vector_store %arg7[%c0_24, %c208], %47 {strides = array<i32>} : memref<4x256xf32, #tpu.memory_space<vmem>>, vector<4x16xf32>,
    %49 = vector.extract_strided_slice %6 {offsets = [0, 14, 0], sizes = [4, 1, 16], strides = [1, 1, 1]} : vector<4x16x16xf32> to vector<4x1x16xf32>
    %50 = vector.shape_cast %49 : vector<4x1x16xf32> to vector<4x16xf32>
    %c0_25 = arith.constant 0 : index
    %c224 = arith.constant 224 : index
    %51 = vector.load %arg7[%c0_25, %c224] : memref<4x256xf32, #tpu.memory_space<vmem>>, vector<4x16xf32>
    tpu.vector_store %arg7[%c0_25, %c224], %50 {strides = array<i32>} : memref<4x256xf32, #tpu.memory_space<vmem>>, vector<4x16xf32>,
    %52 = vector.extract_strided_slice %6 {offsets = [0, 15, 0], sizes = [4, 1, 16], strides = [1, 1, 1]} : vector<4x16x16xf32> to vector<4x1x16xf32>
    %53 = vector.shape_cast %52 : vector<4x1x16xf32> to vector<4x16xf32>
    %c0_26 = arith.constant 0 : index
    %c240 = arith.constant 240 : index
    %54 = vector.load %arg7[%c0_26, %c240] : memref<4x256xf32, #tpu.memory_space<vmem>>, vector<4x16xf32>
    tpu.vector_store %arg7[%c0_26, %c240], %53 {strides = array<i32>} : memref<4x256xf32, #tpu.memory_space<vmem>>, vector<4x16xf32>,
    %c0_27 = arith.constant 0 : index
    %c0_28 = arith.constant 0 : index
    %55 = vector.load %arg7[%c0_27, %c0_28] : memref<4x256xf32, #tpu.memory_space<vmem>>, vector<4x256xf32>
    %c17_i32 = arith.constant 17 : i32
    %56 = tpu.dynamic_rotate %55 by %c17_i32 dim 1 : vector<4x256xf32>, i32 -> vector<4x256xf32>
    %c0_29 = arith.constant 0 : index
    %c0_30 = arith.constant 0 : index
    %c0_31 = arith.constant 0 : index
    %57 = vector.load %arg5[%c0_29, %c0_30, %c0_31] : memref<9x1x256xf32, #tpu.memory_space<vmem>>, vector<1x1x256xf32>
    %58 = vector.shape_cast %57 : vector<1x1x256xf32> to vector<1x256xf32>
    %59 = vector.broadcast %58 : vector<1x256xf32> to vector<4x256xf32>
    %60 = arith.mulf %56, %59 : vector<4x256xf32>
    %c0_32 = arith.constant 0 : index
    %c0_33 = arith.constant 0 : index
    %61 = vector.load %arg8[%c0_32, %c0_33] : memref<36x256xf32, #tpu.memory_space<vmem>>, vector<4x256xf32>
    tpu.vector_store %arg8[%c0_32, %c0_33], %60 {strides = array<i32>} : memref<36x256xf32, #tpu.memory_space<vmem>>, vector<4x256xf32>,
    %c16_i32 = arith.constant 16 : i32
    %62 = tpu.dynamic_rotate %55 by %c16_i32 dim 1 : vector<4x256xf32>, i32 -> vector<4x256xf32>
    %c1 = arith.constant 1 : index
    %c0_34 = arith.constant 0 : index
    %c0_35 = arith.constant 0 : index
    %63 = vector.load %arg5[%c1, %c0_34, %c0_35] : memref<9x1x256xf32, #tpu.memory_space<vmem>>, vector<1x1x256xf32>
    %64 = vector.shape_cast %63 : vector<1x1x256xf32> to vector<1x256xf32>
    %65 = vector.broadcast %64 : vector<1x256xf32> to vector<4x256xf32>
    %66 = arith.mulf %62, %65 : vector<4x256xf32>
    %c4 = arith.constant 4 : index
    %c0_36 = arith.constant 0 : index
    %67 = vector.load %arg8[%c4, %c0_36] : memref<36x256xf32, #tpu.memory_space<vmem>>, vector<4x256xf32>
    tpu.vector_store %arg8[%c4, %c0_36], %66 {strides = array<i32>} : memref<36x256xf32, #tpu.memory_space<vmem>>, vector<4x256xf32>,
    %c15_i32 = arith.constant 15 : i32
    %68 = tpu.dynamic_rotate %55 by %c15_i32 dim 1 : vector<4x256xf32>, i32 -> vector<4x256xf32>
    %c2 = arith.constant 2 : index
    %c0_37 = arith.constant 0 : index
    %c0_38 = arith.constant 0 : index
    %69 = vector.load %arg5[%c2, %c0_37, %c0_38] : memref<9x1x256xf32, #tpu.memory_space<vmem>>, vector<1x1x256xf32>
    %70 = vector.shape_cast %69 : vector<1x1x256xf32> to vector<1x256xf32>
    %71 = vector.broadcast %70 : vector<1x256xf32> to vector<4x256xf32>
    %72 = arith.mulf %68, %71 : vector<4x256xf32>
    %c8 = arith.constant 8 : index
    %c0_39 = arith.constant 0 : index
    %73 = vector.load %arg8[%c8, %c0_39] : memref<36x256xf32, #tpu.memory_space<vmem>>, vector<4x256xf32>
    tpu.vector_store %arg8[%c8, %c0_39], %72 {strides = array<i32>} : memref<36x256xf32, #tpu.memory_space<vmem>>, vector<4x256xf32>,
    %c1_i32 = arith.constant 1 : i32
    %74 = tpu.dynamic_rotate %55 by %c1_i32 dim 1 : vector<4x256xf32>, i32 -> vector<4x256xf32>
    %c3 = arith.constant 3 : index
    %c0_40 = arith.constant 0 : index
    %c0_41 = arith.constant 0 : index
    %75 = vector.load %arg5[%c3, %c0_40, %c0_41] : memref<9x1x256xf32, #tpu.memory_space<vmem>>, vector<1x1x256xf32>
    %76 = vector.shape_cast %75 : vector<1x1x256xf32> to vector<1x256xf32>
    %77 = vector.broadcast %76 : vector<1x256xf32> to vector<4x256xf32>
    %78 = arith.mulf %74, %77 : vector<4x256xf32>
    %c12 = arith.constant 12 : index
    %c0_42 = arith.constant 0 : index
    %79 = vector.load %arg8[%c12, %c0_42] : memref<36x256xf32, #tpu.memory_space<vmem>>, vector<4x256xf32>
    tpu.vector_store %arg8[%c12, %c0_42], %78 {strides = array<i32>} : memref<36x256xf32, #tpu.memory_space<vmem>>, vector<4x256xf32>,
    %c16_43 = arith.constant 16 : index
    %c0_44 = arith.constant 0 : index
    %80 = vector.load %arg8[%c16_43, %c0_44] : memref<36x256xf32, #tpu.memory_space<vmem>>, vector<4x256xf32>
    tpu.vector_store %arg8[%c16_43, %c0_44], %55 {strides = array<i32>} : memref<36x256xf32, #tpu.memory_space<vmem>>, vector<4x256xf32>,
    %c255_i32 = arith.constant 255 : i32
    %81 = tpu.dynamic_rotate %55 by %c255_i32 dim 1 : vector<4x256xf32>, i32 -> vector<4x256xf32>
    %c5 = arith.constant 5 : index
    %c0_45 = arith.constant 0 : index
    %c0_46 = arith.constant 0 : index
    %82 = vector.load %arg5[%c5, %c0_45, %c0_46] : memref<9x1x256xf32, #tpu.memory_space<vmem>>, vector<1x1x256xf32>
    %83 = vector.shape_cast %82 : vector<1x1x256xf32> to vector<1x256xf32>
    %84 = vector.broadcast %83 : vector<1x256xf32> to vector<4x256xf32>
    %85 = arith.mulf %81, %84 : vector<4x256xf32>
    %c20 = arith.constant 20 : index
    %c0_47 = arith.constant 0 : index
    %86 = vector.load %arg8[%c20, %c0_47] : memref<36x256xf32, #tpu.memory_space<vmem>>, vector<4x256xf32>
    tpu.vector_store %arg8[%c20, %c0_47], %85 {strides = array<i32>} : memref<36x256xf32, #tpu.memory_space<vmem>>, vector<4x256xf32>,
    %c241_i32 = arith.constant 241 : i32
    %87 = tpu.dynamic_rotate %55 by %c241_i32 dim 1 : vector<4x256xf32>, i32 -> vector<4x256xf32>
    %c6 = arith.constant 6 : index
    %c0_48 = arith.constant 0 : index
    %c0_49 = arith.constant 0 : index
    %88 = vector.load %arg5[%c6, %c0_48, %c0_49] : memref<9x1x256xf32, #tpu.memory_space<vmem>>, vector<1x1x256xf32>
    %89 = vector.shape_cast %88 : vector<1x1x256xf32> to vector<1x256xf32>
    %90 = vector.broadcast %89 : vector<1x256xf32> to vector<4x256xf32>
    %91 = arith.mulf %87, %90 : vector<4x256xf32>
    %c24 = arith.constant 24 : index
    %c0_50 = arith.constant 0 : index
    %92 = vector.load %arg8[%c24, %c0_50] : memref<36x256xf32, #tpu.memory_space<vmem>>, vector<4x256xf32>
    tpu.vector_store %arg8[%c24, %c0_50], %91 {strides = array<i32>} : memref<36x256xf32, #tpu.memory_space<vmem>>, vector<4x256xf32>,
    %c240_i32 = arith.constant 240 : i32
    %93 = tpu.dynamic_rotate %55 by %c240_i32 dim 1 : vector<4x256xf32>, i32 -> vector<4x256xf32>
    %c7 = arith.constant 7 : index
    %c0_51 = arith.constant 0 : index
    %c0_52 = arith.constant 0 : index
    %94 = vector.load %arg5[%c7, %c0_51, %c0_52] : memref<9x1x256xf32, #tpu.memory_space<vmem>>, vector<1x1x256xf32>
    %95 = vector.shape_cast %94 : vector<1x1x256xf32> to vector<1x256xf32>
    %96 = vector.broadcast %95 : vector<1x256xf32> to vector<4x256xf32>
    %97 = arith.mulf %93, %96 : vector<4x256xf32>
    %c28 = arith.constant 28 : index
    %c0_53 = arith.constant 0 : index
    %98 = vector.load %arg8[%c28, %c0_53] : memref<36x256xf32, #tpu.memory_space<vmem>>, vector<4x256xf32>
    tpu.vector_store %arg8[%c28, %c0_53], %97 {strides = array<i32>} : memref<36x256xf32, #tpu.memory_space<vmem>>, vector<4x256xf32>,
    %c239_i32 = arith.constant 239 : i32
    %99 = tpu.dynamic_rotate %55 by %c239_i32 dim 1 : vector<4x256xf32>, i32 -> vector<4x256xf32>
    %c8_54 = arith.constant 8 : index
    %c0_55 = arith.constant 0 : index
    %c0_56 = arith.constant 0 : index
    %100 = vector.load %arg5[%c8_54, %c0_55, %c0_56] : memref<9x1x256xf32, #tpu.memory_space<vmem>>, vector<1x1x256xf32>
    %101 = vector.shape_cast %100 : vector<1x1x256xf32> to vector<1x256xf32>
    %102 = vector.broadcast %101 : vector<1x256xf32> to vector<4x256xf32>
    %103 = arith.mulf %99, %102 : vector<4x256xf32>
    %c32_57 = arith.constant 32 : index
    %c0_58 = arith.constant 0 : index
    %104 = vector.load %arg8[%c32_57, %c0_58] : memref<36x256xf32, #tpu.memory_space<vmem>>, vector<4x256xf32>
    tpu.vector_store %arg8[%c32_57, %c0_58], %103 {strides = array<i32>} : memref<36x256xf32, #tpu.memory_space<vmem>>, vector<4x256xf32>,
    %c0_59 = arith.constant 0 : index
    %c0_60 = arith.constant 0 : index
    %105 = vector.load %arg4[%c0_59, %c0_60] : memref<8x36xbf16, #tpu.memory_space<vmem>>, vector<8x36xbf16>
    %c0_61 = arith.constant 0 : index
    %c0_62 = arith.constant 0 : index
    %106 = vector.load %arg8[%c0_61, %c0_62] : memref<36x256xf32, #tpu.memory_space<vmem>>, vector<36x256xf32>
    %107 = arith.truncf %106 : vector<36x256xf32> to vector<36x256xbf16>
    %cst_63 = arith.constant dense<0.000000e+00> : vector<8x256xf32>
    %108 = tpu.matmul %105, %107, %cst_63 {dimension_numbers = #tpu.dot_dimension_numbers<[1], [0], [0], [1], [0, 0, 1, 1], [], []>} : vector<8x36xbf16>, vector<36x256xbf16>, vector<8x256xf32> -> vector<8x256xf32>
    %c0_64 = arith.constant 0 : index
    %c0_65 = arith.constant 0 : index
    %c0_66 = arith.constant 0 : index
    %109 = vector.load %arg6[%c0_64, %c0_65, %c0_66] : memref<1x8x256xf32, #tpu.memory_space<vmem>>, vector<1x8x256xf32>
    %110 = vector.shape_cast %109 : vector<1x8x256xf32> to vector<8x256xf32>
    %111 = vector.shape_cast %108 : vector<8x256xf32> to vector<1x8x256xf32>
    tpu.vector_store %arg6[%c0_64, %c0_65, %c0_66], %111 {strides = array<i32>} : memref<1x8x256xf32, #tpu.memory_space<vmem>>, vector<1x8x256xf32>,
    return
  }
  func.func @transform_0(%arg0: i32) -> (i32, i32, i32, i32) {
    %c0_i32 = arith.constant 0 : i32
    %c0_i32_0 = arith.constant 0 : i32
    %c0_i32_1 = arith.constant 0 : i32
    %c0_i32_2 = arith.constant 0 : i32
    return %arg0, %c0_i32, %c0_i32_0, %c0_i32_1 : i32, i32, i32, i32
  }
  func.func @transform_1(%arg0: i32) -> (i32, i32, i32) {
    %c0_i32 = arith.constant 0 : i32
    %c0_i32_0 = arith.constant 0 : i32
    %c0_i32_1 = arith.constant 0 : i32
    %c0_i32_2 = arith.constant 0 : i32
    return %c0_i32, %c0_i32_0, %c0_i32_1 : i32, i32, i32
  }
  func.func @transform_2(%arg0: i32) -> (i32, i32, i32) {
    %c0_i32 = arith.constant 0 : i32
    %c0_i32_0 = arith.constant 0 : i32
    %c0_i32_1 = arith.constant 0 : i32
    %c0_i32_2 = arith.constant 0 : i32
    return %c0_i32, %c0_i32_0, %c0_i32_1 : i32, i32, i32
  }
  func.func @transform_3(%arg0: i32) -> (i32, i32) {
    %c0_i32 = arith.constant 0 : i32
    %c0_i32_0 = arith.constant 0 : i32
    %c0_i32_1 = arith.constant 0 : i32
    return %c0_i32, %c0_i32_0 : i32, i32
  }
  func.func @transform_4(%arg0: i32) -> (i32, i32, i32) {
    %c0_i32 = arith.constant 0 : i32
    %c0_i32_0 = arith.constant 0 : i32
    %c0_i32_1 = arith.constant 0 : i32
    %c0_i32_2 = arith.constant 0 : i32
    return %c0_i32, %c0_i32_0, %c0_i32_1 : i32, i32, i32
  }
  func.func @transform_5(%arg0: i32) -> (i32, i32, i32) {
    %c0_i32 = arith.constant 0 : i32
    %c0_i32_0 = arith.constant 0 : i32
    %c0_i32_1 = arith.constant 0 : i32
    return %arg0, %c0_i32, %c0_i32_0 : i32, i32, i32
  }
}

</mosaic_0001>

<bundles_post_ra>
// kernel: tpu_custom_call.1
= control target key start
LH: loop header
LB: loop body
LE: loop exit
PB: predicated region body
PF: predicated region fallthrough
CT: control target
= control target key end

     0   :  { %10 = vsyncpa [#allocation5], 0  ;;  %s1793_s0 = inlined_call_operand.vmem [shape: bf16[2,4,8,32], index: 0, kind: input, shape index: {}]   ;;  %s1794_s1 = inlined_call_operand.vmem [shape: bf16[4,32,16], index: 1, kind: input, shape index: {}]   ;;  %s1795_s2 = inlined_call_operand.vmem [shape: bf16[4,16,8], index: 2, kind: input, shape index: {}]   ;;  %s1796_s3 = inlined_call_operand.vmem [shape: bf16[8,36], index: 3, kind: input, shape index: {}]   ;;  %s1797_s4 = inlined_call_operand.vmem [shape: f32[9,1,256], index: 4, kind: input, shape index: {}]   ;;  %s1798_s5 = inlined_call_operand.hbm [shape: f32[2,8,256], index: 5, kind: output, shape index: {}]  }
   0x1   :  { %12 = vsyncpa [#allocation5 + $0x1], 0  ;;  %s1393_s18 = smov 0   ;;  %s1395_s19 = smov 0  }
   0x2   :  { %s1397_s20 = smov 0   ;;  %s1399_s21 = smov 0  }
   0x3 LB: > { %s1414_s22 = sadd.s32 4294967295, %s1348_s21   ;;  %s1143_s23 = sadd.s32 4294967294, %s1348_s21   ;;  %s1348_s21 = sphi %s1399_s21, %s1804_s21   ;;  %s1344_s20 = sphi %s1397_s20, %s1803_s20   ;;  %s1340_s19 = sphi %s1395_s19, %s1802_s19   ;;  %s1336_s18 = sphi %s1393_s18, %s1801_s18  }
   0x4   : > { %s1418_s24 = sadd.s32 1, %s1348_s21   ;;  %s135_s25 = sadd.s32 1, %s1344_s20 }
   0x5   : > { %s132_s26 = ssub.s32 %s1348_s21, %s1418_s24  ;;  %p145_p0 = scmp.ne.s32.totalorder %s1344_s20, %s1340_s19 }
   0x6   : > { %p133_p1 = scmp.eq.s32.totalorder %s132_s26, 0  ;;  %p146_p2 = scmp.eq.s32.totalorder %s1414_s22, 1 }
   0x7   : > { %p151_p3 = scmp.ne.s32.totalorder %s1340_s19, %s1336_s18  ;;  %p152_p4 = scmp.eq.s32.totalorder %s1143_s23, 1 }
   0x8   : > { %s1429_s27 = scalar_select %p133_p1, %s1344_s20, %s135_s25  }
   0x9   : > { %p1431_p5 = por %p146_p2, %p145_p0  ;;  %p1435_p6 = por %p152_p4, %p151_p3 }
   0xa   : > { %p1146_p7 = scmp.ge.s32.totalorder %s1348_s21, 1  ;;  %p190_p8 = scmp.lt.s32.totalorder %s1348_s21, 3 }
   0xc   : > { %p191_p9 = pnand %p1146_p7, %p190_p8 }
   0xd   : > { %p218_p10 = scmp.lt.s32.totalorder (!%p191_p9), %s1414_s22, 1  ;;  %s1350_s23 = smov (!%p191_p9), 32  }
   0xe   : > { %194 = sbr.rel (%p191_p9) target bundleno = 845 (0x34d), region = 40  ;;  %s1351_s25 = smov (!%p191_p9), 48  }
   0xf   : > { %s1352_s26 = smov (!%p191_p9), 16   ;;  %s1353_s30 = smov (!%p191_p9), 80  }
  0x10   : > { %s1355_s7 = smov (!%p191_p9), 96   ;;  %s1356_s8 = smov (!%p191_p9), 112  }
  0x11   : > { %s1358_s10 = smov (!%p191_p9), 113   ;;  %s1359_s11 = smov (!%p191_p9), 1  }
  0x12   : > { %s1360_s12 = smov (!%p191_p9), 111   ;;  %s1361_s13 = smov (!%p191_p9), 15  }
  0x13   : > { %v1222_v0 = vld [vmem:[%s1794_s1 + $0x8] sm:$0xff]  ;;  %v1224_v1 = vld [vmem:[%s1794_s1 + $0x18] sm:$0xff]  ;;  %v1221_v4 = vld [vmem:[%s1794_s1] sm:$0xff]  ;;  %s219_s17 = scalar_select %p218_p10, %s1414_s22, 1  ;;  %vm256_vm0 = vcmask 261120   ;;  %vm378_vm1 = vcmask 1043456  }
  0x14   : > { %v1226_v2 = vld [vmem:[%s1794_s1 + $0x28] sm:$0xff]  ;;  %v1228_v3 = vld [vmem:[%s1794_s1 + $0x38] sm:$0xff]  ;;  %266 = vmatpush.bf16.msra.mxu0 %v1222_v0  ;;  %294 = vmatpush.bf16.msra.mxu1 %v1224_v1  ;;  %v1223_v5 = vld [vmem:[%s1794_s1 + $0x10] sm:$0xff]  ;;  %vm374_vm2 = vcmask 64512   ;;  %vm476_vm3 = vcmask 1041409   ;;  %vm478_vm4 = vcmask 1045509  }
  0x15   : > { %322 = vmatpush.bf16.msra.mxu2 %v1226_v2  ;;  %350 = vmatpush.bf16.msra.mxu3 %v1228_v3  ;;  %v1225_v6 = vld [vmem:[%s1794_s1 + $0x20] sm:$0xff]  ;;  %v1227_v7 = vld [vmem:[%s1794_s1 + $0x30] sm:$0xff]  ;;  %s1220_s6 = sshll.u32 %s219_s17, 4  ;;  %v1230_v19 = vld [vmem:[%s1795_s2 + $0x8] sm:$0xff]  ;;  %vm481_vm5 = vcmask 1042434   ;;  %vm483_vm6 = vcmask 1046534  }
  0x16   : > { %s222_s9 = scalar_lea.vmem %s1793_s0, %s1220_s6  ;;  %v1229_v18 = vld [vmem:[%s1795_s2] sm:$0xff]  ;;  %v1231_v28 = vld [vmem:[%s1795_s2 + $0x10] sm:$0xff]  ;;  %v1232_v29 = vld [vmem:[%s1795_s2 + $0x18] sm:$0xff]  ;;  %vm486_vm7 = vcmask 1043459   ;;  %vm488_vm8 = vcmask 1047559   ;;  %vm491_vm9 = vcmask 125952  }
  0x17   : > { %v224_v8 = vld [vmem:[%s222_s9] sm:$0xf]  ;;  %v225_v9 = vld [vmem:[%s222_s9 + $0x4] sm:$0xf]  ;;  %v226_v10 = vld [vmem:[%s222_s9 + $0x8] sm:$0xf] }
  0x18   : > { %267 = vmatpush.bf16.msra.mxu0 %v1221_v4  ;;  %295 = vmatpush.bf16.msra.mxu1 %v1223_v5  ;;  %v227_v11 = vld [vmem:[%s222_s9 + $0xc] sm:$0xf]  ;;  %s1354_s6 = smov 64   ;;  %vm505_vm10 = vcmask 257152   ;;  %vm519_vm11 = vcmask 388352   ;;  %vm533_vm12 = vcmask 519552  }
  0x19   : > { %323 = vmatpush.bf16.msra.mxu2 %v1225_v6  ;;  %351 = vmatpush.bf16.msra.mxu3 %v1227_v7  ;;  %vm559_vm13 = vcmask 650752   ;;  %vm585_vm14 = vcmask 781952   ;;  %vm611_vm15 = vcmask 913152   ;;  %s1357_s9 = smov 127   ;;  %s1362_s14 = smov 17  }
  0x1a   : > { %s215_s17 = sand.u32 1, %s1340_s19  }
  0x1b   : > { %1158 = vmatmul.msk.bf16.vlgmr.msra.gmra.mxu0 %vm256_vm0, %v224_v8  ;;  %1167 = vmatmul.msk.bf16.vlgmr.msra.gmra.mxu1 %vm256_vm0, %v225_v9 }
  0x1c   : > { %1176 = vmatmul.msk.bf16.vlgmr.msra.gmra.mxu2 %vm256_vm0, %v226_v10  ;;  %1185 = vmatmul.msk.bf16.vlgmr.msra.gmra.mxu3 %vm256_vm0, %v227_v11  ;;  %vm637_vm0 = vcmask 1044352  }
  0x98   : > { %v269_v12 = vpop.f32.mrf.mxu0  ;;  %v297_v13 = vpop.f32.mrf.mxu1 }
  0x99   : > { %v365_v14 = vpack.c.bf16 %v269_v12, %v269_v12  ;;  %v366_v15 = vpack.c.bf16 %v297_v13, %v297_v13 }
  0x9b   : > { %v380_v16 = vsel %vm378_vm1, %v365_v14, 0  ;;  %v405_v17 = vsel %vm378_vm1, %v366_v15, 0 }
  0x9c   : > { %389 = vmatpush.bf16.msrb.mxu0 %v380_v16  ;;  %414 = vmatpush.bf16.msrb.mxu1 %v405_v17 }
  0x9f   : > { %v325_v20 = vpop.f32.mrf.mxu2  ;;  %v353_v21 = vpop.f32.mrf.mxu3  ;;  %1190 = vmatmul.msk.bf16.vlgmr.msrb.gmra.mxu0 %vm374_vm2, %v1229_v18  ;;  %1195 = vmatmul.msk.bf16.vlgmr.msrb.gmra.mxu1 %vm374_vm2, %v1230_v19 }
  0xa0   : > { %v367_v22 = vpack.c.bf16 %v325_v20, %v325_v20  ;;  %v368_v23 = vpack.c.bf16 %v353_v21, %v353_v21  ;;  %v271_v24 = vpop.f32.mrf.mxu0  ;;  %v299_v25 = vpop.f32.mrf.mxu1 }
  0xa2   : > { %v430_v26 = vsel %vm378_vm1, %v367_v22, 0  ;;  %v455_v27 = vsel %vm378_vm1, %v368_v23, 0 }
  0xa3   : > { %439 = vmatpush.bf16.msrb.mxu2 %v430_v26  ;;  %464 = vmatpush.bf16.msrb.mxu3 %v455_v27 }
  0xa6   : > { %1200 = vmatmul.msk.bf16.vlgmr.msrb.gmra.mxu2 %vm374_vm2, %v1231_v28  ;;  %1205 = vmatmul.msk.bf16.vlgmr.msrb.gmra.mxu3 %vm374_vm2, %v1232_v29 }
  0xa7   : > { %v327_v30 = vpop.f32.mrf.mxu2  ;;  %v355_v31 = vpop.f32.mrf.mxu3 }
 0x11c   : > { %v1490_v32 = vpop.f32.mrf.mxu0  ;;  %v1492_v33 = vpop.f32.mrf.mxu1 }
 0x11d   : > { %535 = vst.sshfl [vmem:[#allocation1] sm:$0xff pattern:$0x75316420] %v1490_v32  ;;  %v507_v34 = vrot.slane %v1490_v32, 2  ;;  %v508_v35 = vrot.slane %v1492_v33, 1  ;;  %v521_v36 = vrot.slane %v1490_v32, 3 }
 0x11e   : > { %538 = vst.sshfl [vmem:[#allocation1 + $0x10] sm:$0xff pattern:$0x75316420] %v1492_v33  ;;  %v522_v37 = vrot.slane %v1492_v33, 2  ;;  %v493_v38 = vrot.slane %v1490_v32, 1  ;;  %v475_v39 = vrot.slane %v1492_v33, 7 }
 0x11f   : > { %v509_v41 = vsel %vm476_vm3, %v508_v35, %v507_v34 }
 0x120   : > { %v523_v43 = vsel %vm476_vm3, %v522_v37, %v521_v36  ;;  %v494_v44 = vsel %vm476_vm3, %v1492_v33, %v493_v38  ;;  %v477_v45 = vsel %vm476_vm3, %v475_v39, %v1490_v32  ;;  %v510_v48 = vsel %vm478_vm4, %v508_v35, %v509_v41 }
 0x121   : > { %v524_v49 = vsel %vm478_vm4, %v522_v37, %v523_v43  ;;  %v495_v50 = vsel %vm478_vm4, %v1492_v33, %v494_v44  ;;  %v479_v51 = vsel %vm478_vm4, %v475_v39, %v477_v45 }
 0x124   : > { %v1502_v40 = vld [vmem:[#allocation1 + $0x1] ss:$2 sm:$0xff]  ;;  %v1514_v46 = vpop.f32.mrf.mxu0  ;;  %v1516_v47 = vpop.f32.mrf.mxu1 }
 0x125   : > { %561 = vst.sshfl [vmem:[#allocation1] sm:$0xff pattern:$0x75316420] %v1490_v32  ;;  %v1506_v42 = vld [vmem:[#allocation1 + $0x11] ss:$2 sm:$0xff]  ;;  %v680_v54 = vrot.slane %v1514_v46, 3 }
 0x126   : > { %564 = vst.sshfl [vmem:[#allocation1 + $0x10] sm:$0xff pattern:$0x75316420] %v1492_v33  ;;  %v681_v55 = vrot.slane %v1516_v47, 2  ;;  %v667_v56 = vrot.slane %v1514_v46, 2  ;;  %v668_v57 = vrot.slane %v1516_v47, 1 }
 0x127   : > { %v654_v0 = vrot.slane %v1514_v46, 1  ;;  %v547_v1 = vrot.slane %v1506_v42, 7  ;;  %v643_v22 = vrot.slane %v1516_v47, 7 }
 0x128   : > { %v669_v11 = vsel %vm476_vm3, %v668_v57, %v667_v56  ;;  %v682_v18 = vsel %vm476_vm3, %v681_v55, %v680_v54 }
 0x129   : > { %v1523_v52 = vpop.f32.mrf.mxu2  ;;  %v1525_v53 = vpop.f32.mrf.mxu3  ;;  %v655_v20 = vsel %vm476_vm3, %v1516_v47, %v654_v0  ;;  %v670_v26 = vsel %vm478_vm4, %v668_v57, %v669_v11  ;;  %v683_v29 = vsel %vm478_vm4, %v681_v55, %v682_v18  ;;  %v548_v34 = vsel %vm476_vm3, %v547_v1, %v1502_v40 }
 0x12a   : > { %541 = vst.sshfl [vmem:[#allocation1 + $0x20] sm:$0xff pattern:$0x75316420] %v1523_v52  ;;  %v525_v58 = vrot.slane %v1523_v52, 1  ;;  %v511_v59 = vsel %vm481_vm5, %v1523_v52, %v510_v48  ;;  %v513_v60 = vrot.slane %v1525_v53, 7  ;;  %v496_v61 = vrot.slane %v1523_v52, 7 }
 0x12b   : > { %544 = vst.sshfl [vmem:[#allocation1 + $0x30] sm:$0xff pattern:$0x75316420] %v1525_v53  ;;  %v512_v62 = vsel %vm483_vm6, %v1523_v52, %v511_v59  ;;  %v499_v63 = vrot.slane %v1525_v53, 6  ;;  %v480_v6 = vrot.slane %v1523_v52, 6  ;;  %v485_v14 = vrot.slane %v1525_v53, 5 }
 0x12c   : > { %v1543_v2 = vld [vmem:[#allocation1 + $0x1] ss:$2 sm:$0xff]  ;;  %v526_v3 = vsel %vm481_vm5, %v525_v58, %v524_v49  ;;  %v514_v4 = vsel %vm486_vm7, %v513_v60, %v512_v62  ;;  %v497_v5 = vsel %vm481_vm5, %v496_v61, %v495_v50  ;;  %v656_v37 = vsel %vm478_vm4, %v1516_v47, %v655_v20 }
 0x12d   : > { %587 = vst.sshfl [vmem:[#allocation1] sm:$0xff pattern:$0x75316420] %v1490_v32  ;;  %v1550_v7 = vld [vmem:[#allocation1 + $0x11] ss:$2 sm:$0xff]  ;;  %v527_v8 = vsel %vm483_vm6, %v525_v58, %v526_v3  ;;  %v515_v9 = vsel %vm488_vm8, %v513_v60, %v514_v4  ;;  %v498_v10 = vsel %vm483_vm6, %v496_v61, %v497_v5  ;;  %v482_v15 = vsel %vm481_vm5, %v480_v6, %v479_v51 }
 0x12e   : > { %590 = vst.sshfl [vmem:[#allocation1 + $0x10] sm:$0xff pattern:$0x75316420] %v1492_v33  ;;  %v528_v12 = vsel %vm486_vm7, %v1525_v53, %v527_v8  ;;  %516 = vrot.lane.b32.xlu1 %v515_v9, %s1350_s23  ;;  %v500_v13 = vsel %vm486_vm7, %v499_v63, %v498_v10  ;;  %v484_v19 = vsel %vm483_vm6, %v480_v6, %v482_v15  ;;  %v573_v43 = vrot.slane %v1543_v2, 1 }
 0x12f   : > { %v529_v16 = vsel %vm488_vm8, %v1525_v53, %v528_v12  ;;  %v501_v17 = vsel %vm488_vm8, %v499_v63, %v500_v13  ;;  %v487_v21 = vsel %vm486_vm7, %v485_v14, %v484_v19  ;;  %v644_v40 = vsel %vm476_vm3, %v643_v22, %v1514_v46 }
 0x130   : > { %530 = vrot.lane.b32.xlu2 %v529_v16, %s1351_s25  ;;  %502 = vrot.lane.b32.xlu0 %v501_v17, %s1352_s26  ;;  %v489_v27 = vsel %vm488_vm8, %v485_v14, %v487_v21  ;;  %v574_v42 = vsel %vm476_vm3, %v1550_v7, %v573_v43 }
 0x131   : > { %v543_v23 = vld [vmem:[#allocation1 + $0x21] ss:$2 sm:$0xff]  ;;  %v1574_v24 = vpop.f32.mrf.mxu2  ;;  %v1576_v25 = vpop.f32.mrf.mxu3  ;;  %492 = vst.msk [vmem:[#allocation2] sm:$0xf] %vm491_vm9, %v489_v27  ;;  %v575_v8 = vsel %vm478_vm4, %v1550_v7, %v574_v42 }
 0x132   : > { %567 = vst.sshfl [vmem:[#allocation1 + $0x20] sm:$0xff pattern:$0x75316420] %v1523_v52  ;;  %v1581_v28 = vld [vmem:[#allocation1 + $0x31] ss:$2 sm:$0xff]  ;;  %v684_v30 = vrot.slane %v1574_v24, 1  ;;  %v671_v31 = vsel %vm481_vm5, %v1574_v24, %v670_v26 }
 0x133   : > { %570 = vst.sshfl [vmem:[#allocation1 + $0x30] sm:$0xff pattern:$0x75316420] %v1525_v53  ;;  %v672_v35 = vsel %vm483_vm6, %v1574_v24, %v671_v31  ;;  %v673_v36 = vrot.slane %v1576_v25, 7  ;;  %v657_v38 = vrot.slane %v1574_v24, 7  ;;  %v550_v44 = vrot.slane %v543_v23, 6 }
 0x134   : > { %v589_v39 = vld [vmem:[#allocation1 + $0x1] ss:$2 sm:$0xff]  ;;  %v685_v41 = vsel %vm481_vm5, %v684_v30, %v683_v29  ;;  %v660_v50 = vrot.slane %v1576_v25, 6  ;;  %v646_v61 = vrot.slane %v1574_v24, 6  ;;  %v553_v63 = vrot.slane %v1581_v28, 5 }
 0x135   : > { %613 = vst.sshfl [vmem:[#allocation1] sm:$0xff pattern:$0x75316420] %v1490_v32  ;;  %v686_v45 = vsel %vm483_vm6, %v684_v30, %v685_v41  ;;  %v674_v48 = vsel %vm486_vm7, %v673_v36, %v672_v35  ;;  %v658_v49 = vsel %vm481_vm5, %v657_v38, %v656_v37  ;;  %v592_v51 = vld [vmem:[#allocation1 + $0x11] ss:$2 sm:$0xff]  ;;  %v549_v32 = vsel %vm478_vm4, %v547_v1, %v548_v34 }
 0x136   : > { %v687_v54 = vsel %vm486_vm7, %v1576_v25, %v686_v45  ;;  %v675_v55 = vsel %vm488_vm8, %v673_v36, %v674_v48  ;;  %v659_v56 = vsel %vm483_vm6, %v657_v38, %v658_v49  ;;  %616 = vst.sshfl [vmem:[#allocation1 + $0x10] sm:$0xff pattern:$0x75316420] %v1492_v33  ;;  %v551_v59 = vsel %vm481_vm5, %v550_v44, %v549_v32 }
 0x137   : > { %v688_v57 = vsel %vm488_vm8, %v1576_v25, %v687_v54  ;;  %676 = vrot.lane.b32.xlu1 %v675_v55, %s1350_s23  ;;  %v661_v58 = vsel %vm486_vm7, %v660_v50, %v659_v56  ;;  %v645_v33 = vsel %vm478_vm4, %v643_v22, %v644_v40  ;;  %v599_v0 = vrot.slane %v589_v39, 2  ;;  %s1233_s23 = sshll.u32 %s1414_s22, 4 }
 0x138   : > { %689 = vrot.lane.b32.xlu2 %v688_v57, %s1351_s25  ;;  %v662_v60 = vsel %vm488_vm8, %v660_v50, %v661_v58  ;;  %v600_v1 = vrot.slane %v592_v51, 1  ;;  %v649_v2 = vrot.slane %v1576_v25, 5  ;;  %v552_v5 = vsel %vm483_vm6, %v550_v44, %v551_v59  ;;  %s1147_s25 = sshll.u32 %s215_s17, 4 }
 0x139   : > { %663 = vrot.lane.b32.xlu0 %v662_v60, %s1352_s26  ;;  %v569_v62 = vld [vmem:[#allocation1 + $0x21] ss:$2 sm:$0xff]  ;;  %v647_v6 = vsel %vm481_vm5, %v646_v61, %v645_v33  ;;  %v554_v15 = vsel %vm486_vm7, %v553_v63, %v552_v5 }
 0x13a   : > { %v572_v3 = vld [vmem:[#allocation1 + $0x31] ss:$2 sm:$0xff]  ;;  %v576_v4 = vrot.slane %v569_v62, 7  ;;  %593 = vst.sshfl [vmem:[#allocation1 + $0x20] sm:$0xff pattern:$0x75316420] %v1523_v52  ;;  %v648_v9 = vsel %vm483_vm6, %v646_v61, %v647_v6  ;;  %v601_v18 = vsel %vm476_vm3, %v600_v1, %v599_v0  ;;  %v555_v20 = vsel %vm488_vm8, %v553_v63, %v554_v15 }
 0x13b   : > { %596 = vst.sshfl [vmem:[#allocation1 + $0x30] sm:$0xff pattern:$0x75316420] %v1525_v53  ;;  %v579_v12 = vrot.slane %v572_v3, 6  ;;  %v650_v13 = vsel %vm486_vm7, %v649_v2, %v648_v9  ;;  %v602_v22 = vsel %vm478_vm4, %v600_v1, %v601_v18 }
 0x13c   : > { %v1637_v10 = vld [vmem:[#allocation1 + $0x1] ss:$2 sm:$0xff]  ;;  %v577_v11 = vsel %vm481_vm5, %v576_v4, %v575_v8  ;;  %v651_v7 = vsel %vm488_vm8, %v649_v2, %v650_v13 }
 0x13d   : > { %693 = vst.sshfl [vmem:[#allocation1] sm:$0xff pattern:$0x75316420] %v1514_v46  ;;  %v578_v14 = vsel %vm483_vm6, %v576_v4, %v577_v11  ;;  %v1644_v16 = vld [vmem:[#allocation1 + $0x11] ss:$2 sm:$0xff]  ;;  %v625_v55 = vrot.slane %v1637_v10, 3 }
 0x13e   : > { %v580_v17 = vsel %vm486_vm7, %v579_v12, %v578_v14  ;;  %696 = vst.sshfl [vmem:[#allocation1 + $0x10] sm:$0xff pattern:$0x75316420] %v1516_v47  ;;  %v626_v56 = vrot.slane %v1644_v16, 2 }
 0x13f   : > { %v581_v19 = vsel %vm488_vm8, %v579_v12, %v580_v17  ;;  %653 = vst.msk [vmem:[#allocation2 + $0x4] sm:$0xf] %vm491_vm9, %v651_v7 }
 0x140   : > { %582 = vrot.lane.b32.xlu2 %v581_v19, %s1353_s30 }
 0x141   : > { %556 = vrot.lane.b32.xlu0 %v555_v20, %s1354_s6  ;;  %v595_v21 = vld [vmem:[#allocation1 + $0x21] ss:$2 sm:$0xff] }
 0x142   : > { %v598_v23 = vld [vmem:[#allocation1 + $0x31] ss:$2 sm:$0xff]  ;;  %v603_v26 = vsel %vm481_vm5, %v595_v21, %v602_v22  ;;  %619 = vst.sshfl [vmem:[#allocation1 + $0x20] sm:$0xff pattern:$0x75316420] %v1523_v52 }
 0x143   : > { %v604_v27 = vsel %vm483_vm6, %v595_v21, %v603_v26  ;;  %v605_v28 = vrot.slane %v598_v23, 7  ;;  %622 = vst.sshfl [vmem:[#allocation1 + $0x30] sm:$0xff pattern:$0x75316420] %v1525_v53 }
 0x144   : > { %v695_v29 = vld [vmem:[#allocation1 + $0x1] ss:$2 sm:$0xff] }
 0x145   : > { %v606_v30 = vsel %vm486_vm7, %v605_v28, %v604_v27  ;;  %v698_v31 = vld [vmem:[#allocation1 + $0x11] ss:$2 sm:$0xff]  ;;  %718 = vst.sshfl [vmem:[#allocation1] sm:$0xff pattern:$0x75316420] %v1514_v46 }
 0x146   : > { %v607_v34 = vsel %vm488_vm8, %v605_v28, %v606_v30  ;;  %721 = vst.sshfl [vmem:[#allocation1 + $0x10] sm:$0xff pattern:$0x75316420] %v1516_v47  ;;  %v705_v53 = vrot.slane %v698_v31, 7 }
 0x147   : > { %608 = vrot.lane.b32.xlu1 %v607_v34, %s1355_s7 }
 0x148   : > { %v706_v38 = vsel %vm476_vm3, %v705_v53, %v695_v29 }
 0x149   : > { %v621_v35 = vld [vmem:[#allocation1 + $0x21] ss:$2 sm:$0xff]  ;;  %v707_v44 = vsel %vm478_vm4, %v705_v53, %v706_v38 }
 0x14a   : > { %v1665_v52 = vld [vmem:[#allocation1 + $0x31] ss:$2 sm:$0xff]  ;;  %699 = vst.sshfl [vmem:[#allocation1 + $0x20] sm:$0xff pattern:$0x75316420] %v1574_v24  ;;  %v629_v42 = vrot.slane %v621_v35, 1 }
 0x14b   : > { %702 = vst.sshfl [vmem:[#allocation1 + $0x30] sm:$0xff pattern:$0x75316420] %v1576_v25 }
 0x14c   : > { %v720_v36 = vld [vmem:[#allocation1 + $0x1] ss:$2 sm:$0xff] }
 0x14d   : > { %743 = vst.sshfl [vmem:[#allocation1] sm:$0xff pattern:$0x75316420] %v1514_v46  ;;  %v723_v37 = vld [vmem:[#allocation1 + $0x11] ss:$2 sm:$0xff]  ;;  %v730_v48 = vrot.slane %v720_v36, 1 }
 0x14e   : > { %746 = vst.sshfl [vmem:[#allocation1 + $0x10] sm:$0xff pattern:$0x75316420] %v1516_v47 }
 0x14f   : > { %v731_v57 = vsel %vm476_vm3, %v723_v37, %v730_v48 }
 0x150   : > { %v732_v33 = vsel %vm478_vm4, %v723_v37, %v731_v57 }
 0x151   : > { %v701_v39 = vld [vmem:[#allocation1 + $0x21] ss:$2 sm:$0xff] }
 0x152   : > { %v704_v41 = vld [vmem:[#allocation1 + $0x31] ss:$2 sm:$0xff]  ;;  %v708_v43 = vrot.slane %v701_v39, 6  ;;  %724 = vst.sshfl [vmem:[#allocation1 + $0x20] sm:$0xff pattern:$0x75316420] %v1574_v24 }
 0x153   : > { %727 = vst.sshfl [vmem:[#allocation1 + $0x30] sm:$0xff pattern:$0x75316420] %v1576_v25  ;;  %v711_v45 = vrot.slane %v704_v41, 5 }
 0x154   : > { %v709_v40 = vsel %vm481_vm5, %v708_v43, %v707_v44  ;;  %v745_v49 = vld [vmem:[#allocation1 + $0x1] ss:$2 sm:$0xff] }
 0x155   : > { %v710_v50 = vsel %vm483_vm6, %v708_v43, %v709_v40  ;;  %v748_v51 = vld [vmem:[#allocation1 + $0x11] ss:$2 sm:$0xff]  ;;  %768 = vst.sshfl [vmem:[#allocation1] sm:$0xff pattern:$0x75316420] %v1514_v46  ;;  %v755_v59 = vrot.slane %v745_v49, 2 }
 0x156   : > { %v712_v54 = vsel %vm486_vm7, %v711_v45, %v710_v50  ;;  %771 = vst.sshfl [vmem:[#allocation1 + $0x10] sm:$0xff pattern:$0x75316420] %v1516_v47  ;;  %v756_v60 = vrot.slane %v748_v51, 1  ;;  %v627_v47 = vsel %vm476_vm3, %v626_v56, %v625_v55 }
 0x157   : > { %v713_v32 = vsel %vm488_vm8, %v711_v45, %v712_v54  ;;  %v628_v1 = vsel %vm478_vm4, %v626_v56, %v627_v47 }
 0x158   : > { %714 = vrot.lane.b32.xlu1 %v713_v32, %s1354_s6  ;;  %v757_v3 = vsel %vm476_vm3, %v756_v60, %v755_v59  ;;  %v630_v4 = vsel %vm481_vm5, %v629_v42, %v628_v1  ;;  %v1206_v1 = vld [vmem:[%s1797_s4 + $0x2] sm:$0x3]  ;;  %s1079_s6 = scalar_lea.hbm %s1798_s5, %s1233_s23 }
 0x159   : > { %v726_v58 = vld [vmem:[#allocation1 + $0x21] ss:$2 sm:$0xff]  ;;  %v758_v8 = vsel %vm478_vm4, %v756_v60, %v757_v3  ;;  %v631_v9 = vsel %vm483_vm6, %v629_v42, %v630_v4  ;;  %v835_v3 = vperm.slane %v1206_v1, 1 }
 0x15a   : > { %v729_v61 = vld [vmem:[#allocation1 + $0x31] ss:$2 sm:$0xff]  ;;  %v733_v46 = vrot.slane %v726_v58, 7  ;;  %749 = vst.sshfl [vmem:[#allocation1 + $0x20] sm:$0xff pattern:$0x75316420] %v1574_v24  ;;  %v632_v16 = vsel %vm486_vm7, %v1665_v52, %v631_v9 }
 0x15b   : > { %752 = vst.sshfl [vmem:[#allocation1 + $0x30] sm:$0xff pattern:$0x75316420] %v1576_v25  ;;  %v736_v63 = vrot.slane %v729_v61, 6  ;;  %v633_v20 = vsel %vm488_vm8, %v1665_v52, %v632_v16 }
 0x15c   : > { %v734_v62 = vsel %vm481_vm5, %v733_v46, %v732_v33  ;;  %v770_v10 = vld [vmem:[#allocation1 + $0x1] ss:$2 sm:$0xff] }
 0x15d   : > { %v735_v0 = vsel %vm483_vm6, %v733_v46, %v734_v62  ;;  %v773_v11 = vld [vmem:[#allocation1 + $0x11] ss:$2 sm:$0xff]  ;;  %v780_v7 = vrot.slane %v770_v10, 3 }
 0x15e   : > { %v737_v2 = vsel %vm486_vm7, %v736_v63, %v735_v0  ;;  %v781_v17 = vrot.slane %v773_v11, 2 }
 0x15f   : > { %v738_v5 = vsel %vm488_vm8, %v736_v63, %v737_v2  ;;  %v804_v63 = vlaneseq  ;;  %v834_v2 = vperm.slane %v1206_v1, 0 }
 0x160   : > { %739 = vrot.lane.b32.xlu0 %v738_v5, %s1353_s30 }
 0x161   : > { %v751_v6 = vld [vmem:[#allocation1 + $0x21] ss:$2 sm:$0xff]  ;;  %v1722_v0 = vand.u32 127, %v804_v63 }
 0x162   : > { %v754_v12 = vld [vmem:[#allocation1 + $0x31] ss:$2 sm:$0xff]  ;;  %v759_v13 = vsel %vm481_vm5, %v751_v6, %v758_v8  ;;  %774 = vst.sshfl [vmem:[#allocation1 + $0x20] sm:$0xff pattern:$0x75316420] %v1574_v24  ;;  %v782_v24 = vsel %vm476_vm3, %v781_v17, %v780_v7 }
 0x163   : > { %v760_v14 = vsel %vm483_vm6, %v751_v6, %v759_v13  ;;  %v761_v15 = vrot.slane %v754_v12, 7  ;;  %777 = vst.sshfl [vmem:[#allocation1 + $0x30] sm:$0xff pattern:$0x75316420] %v1576_v25  ;;  %v783_v22 = vsel %vm478_vm4, %v781_v17, %v782_v24  ;;  %vm828_vm1 = vcmp.lt.s32.totalorder %v1722_v0, 16 }
 0x164   : > { %vm916_vm2 = vcmp.lt.s32.totalorder %v1722_v0, 127  ;;  %vm945_vm3 = vcmp.lt.s32.totalorder %v1722_v0, 113  ;;  %vm968_vm4 = vcmp.lt.s32.totalorder %v1722_v0, 112  ;;  %vm806_vm9 = vcmp.lt.s32.totalorder %v1722_v0, 17 }
 0x165   : > { %v762_v18 = vsel %vm486_vm7, %v761_v15, %v760_v14  ;;  %v1209_v14 = vld [vmem:[%s1797_s4 + $0xa] sm:$0x3] }
 0x166   : > { %v763_v19 = vsel %vm488_vm8, %v761_v15, %v762_v18  ;;  %v922_v15 = vperm.slane %v1209_v14, 0  ;;  %v923_v16 = vperm.slane %v1209_v14, 1 }
 0x167   : > { %764 = vrot.lane.b32.xlu2 %v763_v19, %s1355_s7  ;;  %s217_s7 = scalar_lea.vmem [#allocation4], %s1147_s25 }
 0x168   : > { %634 = vrot.lane.b32.xlu0 %v633_v20, %s1356_s8 }
 0x169   : > { %v776_v25 = vld [vmem:[#allocation1 + $0x21] ss:$2 sm:$0xff] }
 0x16a   : > { %v784_v21 = vrot.slane %v776_v25, 1  ;;  %v779_v26 = vld [vmem:[#allocation1 + $0x31] ss:$2 sm:$0xff]  ;;  %v1210_v25 = vld [vmem:[%s1797_s4 + $0xc] sm:$0x3] }
 0x16c   : > { %v785_v23 = vsel %vm481_vm5, %v784_v21, %v783_v22  ;;  %vm997_vm5 = vcmp.lt.s32.totalorder %v1722_v0, 111 }
 0x16d   : > { %v786_v27 = vsel %vm483_vm6, %v784_v21, %v785_v23  ;;  %v951_v23 = vperm.slane %v1210_v25, 0  ;;  %vm857_vm6 = vcmp.lt.s32.totalorder %v1722_v0, 15 }
 0x16e   : > { %v787_v28 = vsel %vm486_vm7, %v779_v26, %v786_v27  ;;  %vm880_vm7 = vcmp.lt.s32.totalorder %v1722_v0, 1 }
 0x16f   : > { %v788_v29 = vsel %vm488_vm8, %v779_v26, %v787_v28  ;;  %v952_v26 = vperm.slane %v1210_v25, 1  ;;  %vm1032_vm8 = vcmask 1041408  }
 0x170   : > { %789 = vrot.lane.b32.xlu1 %v788_v29, %s1356_s8 }
 0x18a   : > { %v531_v30 = vpop.permute.xlu2 %530 }
 0x192   : > { %v690_v35 = vpop.permute.xlu2 %689 }
 0x19a   : > { %v583_v37 = vpop.permute.xlu2 %582 }
 0x1a0   : > { %v517_v31 = vpop.permute.xlu1 %516 }
 0x1a2   : > { %v503_v34 = vpop.permute.xlu0 %502 }
 0x1a3   : > { %506 = vst.msk [vmem:[#allocation2] sm:$0xf] %vm505_vm10, %v503_v34 }
 0x1a4   : > { %520 = vst.msk [vmem:[#allocation2] sm:$0xf] %vm519_vm11, %v517_v31 }
 0x1a5   : > { %534 = vst.msk [vmem:[#allocation2] sm:$0xf] %vm533_vm12, %v531_v30 }
 0x1a9   : > { %v677_v53 = vpop.permute.xlu1 %676 }
 0x1ab   : > { %v664_v52 = vpop.permute.xlu0 %663 }
 0x1ac   : > { %666 = vst.msk [vmem:[#allocation2 + $0x4] sm:$0xf] %vm505_vm10, %v664_v52  ;;  %vm1028_vm10 = vcmask 293888  }
 0x1ad   : > { %679 = vst.msk [vmem:[#allocation2 + $0x4] sm:$0xf] %vm519_vm11, %v677_v53 }
 0x1ae   : > { %692 = vst.msk [vmem:[#allocation2 + $0x4] sm:$0xf] %vm533_vm12, %v690_v35  ;;  %v1211_v35 = vld [vmem:[%s1797_s4 + $0xe] sm:$0x3] }
 0x1af   : > { %v974_v52 = vperm.slane %v1211_v35, 0  ;;  %v975_v53 = vperm.slane %v1211_v35, 1 }
 0x1b3   : > { %v557_v36 = vpop.permute.xlu0 %556 }
 0x1b4   : > { %560 = vst.msk [vmem:[#allocation2] sm:$0xf] %vm559_vm13, %v557_v36 }
 0x1b5   : > { %586 = vst.msk [vmem:[#allocation2] sm:$0xf] %vm585_vm14, %v583_v37 }
 0x1b9   : > { %v609_v38 = vpop.permute.xlu1 %608 }
 0x1ba   : > { %612 = vst.msk [vmem:[#allocation2] sm:$0xf] %vm611_vm15, %v609_v38 }
 0x1c1   : > { %v765_v43 = vpop.permute.xlu2 %764 }
 0x1ca   : > { %v715_v39 = vpop.permute.xlu1 %714 }
 0x1cb   : > { %717 = vst.msk [vmem:[#allocation2 + $0x4] sm:$0xf] %vm559_vm13, %v715_v39 }
 0x1d2   : > { %v740_v41 = vpop.permute.xlu0 %739 }
 0x1d3   : > { %742 = vst.msk [vmem:[#allocation2 + $0x4] sm:$0xf] %vm585_vm14, %v740_v41 }
 0x1d4   : > { %767 = vst.msk [vmem:[#allocation2 + $0x4] sm:$0xf] %vm611_vm15, %v765_v43 }
 0x1da   : > { %v635_v44 = vpop.permute.xlu0 %634 }
 0x1db   : > { %638 = vst.msk [vmem:[#allocation2] sm:$0xf] %vm637_vm0, %v635_v44  ;;  %v1212_v44 = vld [vmem:[%s1797_s4 + $0x10] sm:$0x3] }
 0x1e2   : > { %v790_v40 = vpop.permute.xlu1 %789 }
 0x1e3   : > { %792 = vst.msk [vmem:[#allocation2 + $0x4] sm:$0xf] %vm637_vm0, %v790_v40 }
 0x1ea   : > { %v793_v45 = vld [vmem:[#allocation2] sm:$0xff] }
 0x1eb   : > { %795 = vst [vmem:[#allocation1] ss:$2 sm:$0xff] %v793_v45 }
 0x1f2   : > { %v796_v48 = vld.sshfl [vmem:[#allocation1] sm:$0xff pattern:$0x75316420]  ;;  %v797_v49 = vld.sshfl [vmem:[#allocation1 + $0x8] sm:$0xff pattern:$0x75316420] }
 0x1f3   : > { %819 = vst [vmem:[#allocation1] ss:$2 sm:$0xff] %v793_v45 }
 0x1fa   : > { %v821_v50 = vld.sshfl [vmem:[#allocation1 + $0x8] sm:$0xff pattern:$0x75316420]  ;;  %v820_v51 = vld.sshfl [vmem:[#allocation1] sm:$0xff pattern:$0x75316420] }
 0x1fb   : > { %826 = vrot.lane.b32.xlu2 %v821_v50, %s1352_s26  ;;  %824 = vrot.lane.b32.xlu1 %v820_v51, %s1352_s26  ;;  %848 = vst [vmem:[#allocation1] ss:$2 sm:$0xff] %v793_v45  ;;  %v1004_v50 = vperm.slane %v1212_v44, 1 }
 0x202   : > { %v849_v54 = vld.sshfl [vmem:[#allocation1] sm:$0xff pattern:$0x75316420]  ;;  %v850_v55 = vld.sshfl [vmem:[#allocation1 + $0x8] sm:$0xff pattern:$0x75316420] }
 0x203   : > { %871 = vst [vmem:[#allocation1] ss:$2 sm:$0xff] %v793_v45 }
 0x20a   : > { %v872_v56 = vld.sshfl [vmem:[#allocation1] sm:$0xff pattern:$0x75316420]  ;;  %v873_v32 = vld.sshfl [vmem:[#allocation1 + $0x8] sm:$0xff pattern:$0x75316420] }
 0x20b   : > { %900 = vst [vmem:[#allocation1] ss:$2 sm:$0xff] %v793_v45 }
 0x212   : > { %v901_v57 = vld.sshfl [vmem:[#allocation1] sm:$0xff pattern:$0x75316420]  ;;  %v902_v58 = vld.sshfl [vmem:[#allocation1 + $0x8] sm:$0xff pattern:$0x75316420] }
 0x213   : > { %907 = vst [vmem:[#allocation1] ss:$2 sm:$0xff] %v793_v45 }
 0x214   : > { %905 = vst [vmem:[#allocation3 + $0x48] sm:$0xf] %v901_v57 }
 0x215   : > { %906 = vst [vmem:[#allocation3 + $0x28] sm:$0xf] %v902_v58  ;;  %v1207_v58 = vld [vmem:[%s1797_s4 + $0x4] sm:$0x3] }
 0x21a   : > { %v909_v59 = vld.sshfl [vmem:[#allocation1 + $0x8] sm:$0xff pattern:$0x75316420]  ;;  %v908_v60 = vld.sshfl [vmem:[#allocation1] sm:$0xff pattern:$0x75316420] }
 0x21b   : > { %914 = vrot.lane.b32.xlu2 %v909_v59, %s1357_s9  ;;  %912 = vrot.lane.b32.xlu1 %v908_v60, %s1357_s9  ;;  %936 = vst [vmem:[#allocation1] ss:$2 sm:$0xff] %v793_v45  ;;  %v1208_v59 = vld [vmem:[%s1797_s4 + $0x6] sm:$0x3]  ;;  %v863_v60 = vperm.slane %v1207_v58, 0  ;;  %s1083_s9 = sshll.u32 %s1079_s6, 4  ;;  %s1084_s9 = int_to_ptr.hbm [resolvable:$true] %s1083_s9 }
 0x222   : > { %v938_v42 = vld.sshfl [vmem:[#allocation1 + $0x8] sm:$0xff pattern:$0x75316420]  ;;  %v937_v61 = vld.sshfl [vmem:[#allocation1] sm:$0xff pattern:$0x75316420] }
 0x223   : > { %943 = vrot.lane.b32.xlu0 %v938_v42, %s1358_s10  ;;  %941 = vrot.lane.b32.xlu2 %v937_v61, %s1358_s10  ;;  %959 = vst [vmem:[#allocation1] ss:$2 sm:$0xff] %v793_v45  ;;  %v864_v42 = vperm.slane %v1207_v58, 1  ;;  %v886_v61 = vperm.slane %v1208_v59, 0  ;;  %s1068_s10 = scalar_lea.sflag [#allocation5], %s215_s17 }
 0x22a   : > { %v961_v46 = vld.sshfl [vmem:[#allocation1 + $0x8] sm:$0xff pattern:$0x75316420]  ;;  %v960_v47 = vld.sshfl [vmem:[#allocation1] sm:$0xff pattern:$0x75316420] }
 0x22b   : > { %966 = vrot.lane.b32.xlu1 %v961_v46, %s1356_s8  ;;  %964 = vrot.lane.b32.xlu0 %v960_v47, %s1356_s8  ;;  %988 = vst [vmem:[#allocation1] ss:$2 sm:$0xff] %v793_v45  ;;  %v887_v46 = vperm.slane %v1208_v59, 1  ;;  %s1081_s8 = sshll.u32 %s217_s7, 4  ;;  %s1082_s8 = int_to_ptr.vmem [resolvable:$true] %s1081_s8 }
 0x232   : > { %v990_v33 = vld.sshfl [vmem:[#allocation1 + $0x8] sm:$0xff pattern:$0x75316420]  ;;  %v989_v62 = vld.sshfl [vmem:[#allocation1] sm:$0xff pattern:$0x75316420] }
 0x233   : > { %878 = vrot.lane.b32.xlu1 %v873_v32, %s1359_s11  ;;  %995 = vrot.lane.b32.xlu0 %v990_v33, %s1360_s12 }
 0x234   : > { %993 = vrot.lane.b32.xlu2 %v989_v62, %s1360_s12 }
 0x23b   : > { %853 = vrot.lane.b32.xlu1 %v849_v54, %s1361_s13  ;;  %876 = vrot.lane.b32.xlu0 %v872_v56, %s1359_s11  ;;  %s1300_s11 = sshra.s32 %s1084_s9, 4  ;;  %s1301_s11 = int_to_ptr.hbm [resolvable:$true] %s1300_s11 }
 0x23c   : > { %800 = vrot.lane.b32.xlu2 %v796_v48, %s1362_s14  ;;  %s1302_s12 = scalar_lea.hbm %s1301_s11, 16  ;;  %p1307_p0 = scmp.lt.s32.totalorder %s1301_s11, %s1798_s5 }
 0x23d   : > { %p1303_p11 = scmp.ne.s32.totalorder %s1301_s11, %s1302_s12 }
 0x23f   : > { %p1304_p12 = pnand %p1303_p11, %p1431_p5 }
 0x241   : > { %p1305_p13 = pneg %p1304_p12 }
 0x243   : > { %802 = vrot.lane.b32.xlu0 %v797_v49, %s1362_s14  ;;  %v1003_v49 = vperm.slane %v1212_v44, 0  ;;  %s1306_s14 = scalar_lea.hbm %s1798_s5, 32 }
 0x244   : > { %855 = vrot.lane.b32.xlu2 %v850_v55, %s1361_s13  ;;  %p1308_p1 = scmp.lt.s32.totalorder %s1306_s14, %s1302_s12 }
 0x246   : > { %p1309_p2 = por %p1308_p1, %p1307_p0 }
 0x248   : > { %p1310_p3 = pnand %p1309_p2, %p1305_p13 }
 0x255   : > { %v827_v4 = vpop.permute.xlu2 %826 }
 0x26d   : > { %v825_v5 = vpop.permute.xlu1 %824 }
 0x26e   : > { %v829_v6 = vsel %vm828_vm1, %v825_v5, %v827_v4  ;;  %v830_v8 = vsel %vm828_vm1, %v827_v4, %v825_v5 }
 0x26f   : > { %v838_v9 = vmul.f32 %v834_v2, %v830_v8  ;;  %v839_v10 = vmul.f32 %v835_v3, %v829_v6 }
 0x271   : > { %v842_v11 = vrot.slane %v838_v9, 4  ;;  %v843_v12 = vrot.slane %v839_v10, 4  ;;  %v809_v10 = vld [vmem:[%s1797_s4] sm:$0x3] }
 0x273   : > { %846 = vst [vmem:[#allocation3 + $0x30] sm:$0xf0] %v842_v11 }
 0x274   : > { %847 = vst [vmem:[#allocation3] sm:$0xf0] %v843_v12 }
 0x275   : > { %v915_v13 = vpop.permute.xlu2 %914 }
 0x27d   : > { %v942_v24 = vpop.permute.xlu2 %941 }
 0x28d   : > { %v913_v7 = vpop.permute.xlu1 %912 }
 0x28e   : > { %v917_v17 = vsel %vm916_vm2, %v913_v7, %v915_v13  ;;  %v918_v18 = vsel %vm916_vm2, %v915_v13, %v913_v7  ;;  %v994_v34 = vpop.permute.xlu2 %993  ;;  %v811_v7 = vperm.slane %v809_v10, 0 }
 0x28f   : > { %v926_v19 = vmul.f32 %v922_v15, %v917_v17  ;;  %v927_v20 = vmul.f32 %v923_v16, %v918_v18  ;;  %v812_v17 = vperm.slane %v809_v10, 1 }
 0x291   : > { %v930_v21 = vrot.slane %v926_v19, 4  ;;  %v931_v22 = vrot.slane %v927_v20, 4 }
 0x293   : > { %934 = vst [vmem:[#allocation3 + $0x48] sm:$0xf0] %v930_v21 }
 0x294   : > { %935 = vst [vmem:[#allocation3 + $0x28] sm:$0xf0] %v931_v22 }
 0x295   : > { %v944_v27 = vpop.permute.xlu0 %943 }
 0x296   : > { %v946_v28 = vsel %vm945_vm3, %v942_v24, %v944_v27  ;;  %v947_v29 = vsel %vm945_vm3, %v944_v27, %v942_v24  ;;  %v801_v48 = vpop.permute.xlu2 %800 }
 0x297   : > { %v955_v30 = vmul.f32 %v951_v23, %v946_v28  ;;  %v956_v31 = vmul.f32 %v952_v26, %v947_v29 }
 0x299   : > { %957 = vst [vmem:[#allocation3 + $0x8] sm:$0xf] %v955_v30 }
 0x29a   : > { %958 = vst [vmem:[#allocation3 + $0x20] sm:$0xf] %v956_v31  ;;  %v1016_v25 = vld [vmem:[#allocation3 + $0x48] sm:$0xff] }
 0x29b   : > { %v1017_v26 = vld [vmem:[#allocation3 + $0x28] sm:$0xff] }
 0x29d   : > { %v967_v36 = vpop.permute.xlu1 %966  ;;  %v965_v37 = vpop.permute.xlu0 %964 }
 0x29e   : > { %v969_v38 = vsel %vm968_vm4, %v965_v37, %v967_v36  ;;  %v970_v39 = vsel %vm968_vm4, %v967_v36, %v965_v37  ;;  %v856_v47 = vpop.permute.xlu2 %855 }
 0x29f   : > { %v978_v41 = vmul.f32 %v974_v52, %v969_v38  ;;  %v979_v43 = vmul.f32 %v975_v53, %v970_v39  ;;  %v1011_v53 = vld [vmem:[%s1796_s3] sm:$0xf] }
 0x2a1   : > { %v982_v40 = vrot.slane %v978_v41, 4  ;;  %v983_v45 = vrot.slane %v979_v43, 4 }
 0x2a3   : > { %986 = vst [vmem:[#allocation3 + $0x8] sm:$0xf0] %v982_v40 }
 0x2a4   : > { %987 = vst [vmem:[#allocation3 + $0x20] sm:$0xf0] %v983_v45 }
 0x2a5   : > { %v879_v51 = vpop.permute.xlu1 %878  ;;  %v996_v54 = vpop.permute.xlu0 %995 }
 0x2a6   : > { %v998_v55 = vsel %vm997_vm5, %v994_v34, %v996_v54  ;;  %v999_v56 = vsel %vm997_vm5, %v996_v54, %v994_v34 }
 0x2a7   : > { %v1007_v32 = vmul.f32 %v1003_v49, %v998_v55  ;;  %v1008_v57 = vmul.f32 %v1004_v50, %v999_v56 }
 0x2a9   : > { %1009 = vst [vmem:[#allocation3 + $0x40] sm:$0xf] %v1007_v32 }
 0x2aa   : > { %1010 = vst [vmem:[#allocation3 + $0x38] sm:$0xf] %v1008_v57  ;;  %v1018_v18 = vld [vmem:[#allocation3 + $0x8] sm:$0xff] }
 0x2ab   : > { %v1019_v20 = vld [vmem:[#allocation3 + $0x20] sm:$0xff]  ;;  %v1024_v23 = vpack.c.bf16 %v1018_v18, %v1016_v25 }
 0x2ac   : > { %v1025_v28 = vpack.c.bf16 %v1019_v20, %v1017_v26 }
 0x2ad   : > { %v854_v33 = vpop.permute.xlu1 %853  ;;  %v877_v62 = vpop.permute.xlu0 %876 }
 0x2ae   : > { %v858_v63 = vsel %vm857_vm6, %v854_v33, %v856_v47  ;;  %v859_v1 = vsel %vm857_vm6, %v856_v47, %v854_v33  ;;  %v881_v2 = vsel %vm880_vm7, %v877_v62, %v879_v51  ;;  %v882_v3 = vsel %vm880_vm7, %v879_v51, %v877_v62 }
 0x2af   : > { %v867_v4 = vmul.f32 %v863_v60, %v859_v1  ;;  %v868_v5 = vmul.f32 %v864_v42, %v858_v63  ;;  %v890_v6 = vmul.f32 %v886_v61, %v882_v3  ;;  %v891_v8 = vmul.f32 %v887_v46, %v881_v2 }
 0x2b0   : > { %v1020_v9 = vld [vmem:[#allocation3 + $0x40] sm:$0xf] }
 0x2b1   : > { %869 = vst [vmem:[#allocation3 + $0x18] sm:$0xf] %v867_v4  ;;  %v894_v11 = vrot.slane %v890_v6, 4  ;;  %v895_v12 = vrot.slane %v891_v8, 4  ;;  %v1026_v13 = vpack.c.bf16 %v1020_v9, %v1020_v9  ;;  %v1021_v14 = vld [vmem:[#allocation3 + $0x38] sm:$0xf] }
 0x2b2   : > { %870 = vst [vmem:[#allocation3 + $0x10] sm:$0xf] %v868_v5  ;;  %v1027_v15 = vpack.c.bf16 %v1021_v14, %v1021_v14 }
 0x2b3   : > { %898 = vst [vmem:[#allocation3 + $0x18] sm:$0xf0] %v894_v11  ;;  %v1034_v16 = vsel %vm1032_vm8, %v1026_v13, 0 }
 0x2b4   : > { %899 = vst [vmem:[#allocation3 + $0x10] sm:$0xf0] %v895_v12  ;;  %1044 = vmatpush.bf16.msra.mxu0 %v1034_v16  ;;  %v1037_v19 = vsel %vm1032_vm8, %v1027_v15, 0 }
 0x2b5   : > { %1057 = vmatpush.bf16.msra.mxu1 %v1037_v19  ;;  %v803_v24 = vpop.permute.xlu0 %802 }
 0x2b6   : > { %v807_v21 = vsel %vm806_vm9, %v801_v48, %v803_v24  ;;  %v808_v22 = vsel %vm806_vm9, %v803_v24, %v801_v48 }
 0x2b7   : > { %v815_v27 = vmul.f32 %v811_v7, %v808_v22  ;;  %v816_v0 = vmul.f32 %v812_v17, %v807_v21 }
 0x2b8   : > { %1045 = vmatpush.bf16.msra.mxu0 %v1024_v23 }
 0x2b9   : > { %817 = vst [vmem:[#allocation3 + $0x30] sm:$0xf] %v815_v27  ;;  %1058 = vmatpush.bf16.msra.mxu1 %v1025_v28 }
 0x2ba   : > { %818 = vst [vmem:[#allocation3] sm:$0xf] %v816_v0  ;;  %v1014_v30 = vld [vmem:[#allocation3 + $0x18] sm:$0xff] }
 0x2bb   : > { %v1015_v35 = vld [vmem:[#allocation3 + $0x10] sm:$0xff] }
 0x2c0   : > { %v1012_v29 = vld [vmem:[#allocation3 + $0x30] sm:$0xff] }
 0x2c1   : > { %v1022_v31 = vpack.c.bf16 %v1014_v30, %v1012_v29  ;;  %v1013_v34 = vld [vmem:[#allocation3] sm:$0xff] }
 0x2c2   : > { %v1023_v52 = vpack.c.bf16 %v1015_v35, %v1013_v34 }
 0x2c3   : > { %1046 = vmatpush.bf16.msra.mxu0 %v1022_v31 }
 0x2c4   : > { %1059 = vmatpush.bf16.msra.mxu1 %v1023_v52 }
 0x2c6   : > { %1213 = vmatmul.msk.bf16.vlgmr.msra.gmra.mxu0 %vm1028_vm10, %v1011_v53 }
 0x2c7   : > { %1214 = vmatmul.msk.bf16.vlgmr.msra.gmra.mxu1 %vm1028_vm10, %v1011_v53 }
 0x343   : > { %v1048_v36 = vpop.f32.mrf.mxu0 }
 0x344   : > { %1065 = vst [vmem:[%s217_s7] sm:$0xff] %v1048_v36  ;;  %v1061_v37 = vpop.f32.mrf.mxu1 }
 0x345   : > { %1066 = vst [vmem:[%s217_s7 + $0x8] sm:$0xff] %v1061_v37 }
 0x346   : > { %1313 = shalt.err (!%p1310_p3)
}
 0x347   : > { %1234 = dma.vmem_to_hbm [thread:$0]  (%p1431_p5), %s1082_s8, 256, %s1084_s9, %s1068_s10  }
 0x34b   : > { %v1050_v38 = vpop.f32.mrf.mxu0 }
 0x34c   : > { %v1063_v39 = vpop.f32.mrf.mxu1 }
 0x34d PF: > { %p1240_p4 = scmp.ge.s32.totalorder %s1348_s21, 2  ;;  %s1095_s17 = sand.u32 1, %s1336_s18  }
 0x34e   : > { %s1096_s23 = scalar_lea.sflag [#allocation5], %s1095_s17 }
 0x34f   : > { %p1237_p7 = pnand %p1240_p4, %p1435_p6 }
 0x351   : > { %p1238_p8 = pneg %p1237_p7 }
 0x353   : > { %1331 = dma.done.wait (%p1238_p8), %s1096_s23, 256  }
 0x354   : > { %1333 = vsyncadd (%p1238_p8), %s1096_s23, 4294967040  ;;  %p15_p5 = scmp.ge.s32.totalorder %s1418_s24, 4   ;;  %s1801_s18 = smov %s1340_s19 }
 0x355   : > { %s1802_s19 = smov %s1344_s20  ;;  %s1803_s20 = smov %s1429_s27 }
 0x356   : > { %s1804_s21 = smov %s1418_s24  ;;  %17 = sbr.rel (!%p15_p5) target bundleno = 3 (0x3), region = 114 }
 0x35b   :  { %1102 = vsyncpa [#allocation5], 1 }
 0x35c   :  { %1104 = vsyncpa [#allocation5 + $0x1], 1 }

</bundles_post_ra>
